<compile_context>
chip_gen: v6e
topology: v6e:2x2x1
jax: 0.10.0
libtpu: 0.0.40
codegen_flags: <defaults>
</compile_context>

<pallas_src>
import functools

import jax
import jax.numpy as jnp
from jax import lax
from jax.experimental import pallas as pl
from jax.experimental.pallas import tpu as pltpu


def _round_up(x, m):
    return ((x + m - 1) // m) * m


def _frag_embed_kernel(ids_ref, table_ref, o_ref, *, pack, vocab, mp1, d):
    # ids_ref  : (TG, 2*pack) int32  cols [0,pack): fragment ids, [pack,2*pack): root bond pos
    # table_ref: (pack*(V+Mp1), 2*pack*D) f32   fused block-diagonal gather table
    # o_ref    : (TG, pack*D) f32   lane-dense output: `pack` tokens per 128-lane row
    tg = ids_ref.shape[0]
    pv = pack * vocab
    pvm = pack * (vocab + mp1)
    pd = pack * d

    col = lax.broadcasted_iota(jnp.int32, (tg, pvm), 1)

    # Combined 0/1 selector: for each packed token slot j, one hit for its embedding
    # row (idx half, block j) and one for its bond-position row (rbp half, block j).
    # Accumulate as bools; cast to f32 exactly once (saves VALU work on v5e).
    hit = None
    for j in range(pack):  # pack is small (<= 8); unrolled at trace time
        idx_j = ids_ref[:, j:j + 1]                  # (TG, 1) int32
        rbp_j = ids_ref[:, pack + j:pack + j + 1]    # (TG, 1) int32
        h = (col == idx_j + j * vocab) | (col == pv + rbp_j + j * mp1)
        hit = h if hit is None else hit | h
    sel = hit.astype(jnp.float32)                    # (TG, pvm), exactly 0/1

    # Single MXU op per step.  HIGHEST precision so the f32 table rows are gathered
    # exactly (a 0/1 selector times the 3-way bf16 split reconstructs f32 exactly).
    res = jnp.dot(sel, table_ref[...],
                  preferred_element_type=jnp.float32,
                  precision=jax.lax.Precision.HIGHEST)      # (TG, 2*pack*D)

    # Lane split at pack*D (=128 for D=32) is a vreg boundary -> free slicing.
    o_ref[...] = res[:, :pd] * res[:, pd:]


def prepare_frag_embed_tables(params):
    """One-time precompute (hoisted out of the per-call path).

    Folds the linear projection into the gather tables
        w = (bpt[idx] + ohp[rbp]) @ W^T + b  ==  (bpt@W^T + b)[idx] + (ohp@W^T)[rbp]
    and packs everything block-diagonally into ONE fused table so the kernel's single
    matmul directly produces a lane-dense (pack tokens x 128 lanes) embed|w result.
    """
    emb = params["embedding"]                 # (V, D)
    bpt = params["bond_pos_tensors"]          # (V+1, M)
    ohp = params["one_hot_pos"]               # (M+1, M)
    w_t = params["proj_weight_t"]             # (M, D)
    b = params["proj_bias"]                   # (D,)

    V, D = emb.shape
    M = bpt.shape[1]
    Mp1 = ohp.shape[0]

    hp = jax.lax.Precision.HIGHEST
    # idx is always < V (clamped in the wrapper), so padding row V of bpt is unused.
    bptp = jnp.dot(bpt[:V], w_t, precision=hp) + b[None, :]   # (V, D)
    wpad = jnp.dot(ohp, w_t, precision=hp)                    # (Mp1, D)

    # Pack `pack` tokens per 128-lane output row (D=32 -> pack=4).
    pack = 128 // D if (D < 128 and 128 % D == 0) else 1
    eye_p = jnp.eye(pack, dtype=jnp.float32)
    top = jnp.concatenate([jnp.kron(eye_p, emb), jnp.kron(eye_p, bptp)], axis=1)
    bot = jnp.concatenate([jnp.zeros((pack * Mp1, pack * D), jnp.float32),
                           jnp.kron(eye_p, wpad)], axis=1)
    table = jnp.concatenate([top, bot], axis=0)                # (pack*(V+Mp1), 2*pack*D)

    return {"table": table, "pack": pack, "vocab": V, "mp1": Mp1,
            "max_bond_cnt": M, "embed_dim": D}


def _vmem_cap_bytes():
    try:
        return int(pltpu.get_tpu_info().vmem_capacity_bytes)
    except Exception:
        return 64 << 20   # assume the smallest generation (v7x) if the query fails


def frag_embeddings_forward(idx, root_bond_pos, tables, *, tile_n=4096):
    """idx, root_bond_pos: int32 [B, S].  Returns f32 [B, S, D]."""
    table = tables["table"]
    pack = tables["pack"]
    V = tables["vocab"]
    Mp1 = tables["mp1"]
    M = tables["max_bond_cnt"]
    D = tables["embed_dim"]

    B, S = idx.shape
    n = B * S

    # Token tile: big (amortizes per-step overhead), but
    #   * a multiple of 8*pack (8 sublanes of packed output rows),
    #   * capped at ~half the padded problem so the grid keeps >= 2 steps and both
    #     v7x TensorCores get work under dimension_semantics=("parallel",),
    #   * never larger than the padded problem itself (tiny inputs don't over-pad).
    row_align = 8 * pack
    n_min = _round_up(n, row_align)
    half = _round_up((n_min + 1) // 2, row_align)
    tile_n = max(row_align, min(_round_up(tile_n, row_align), half))
    n_pad = _round_up(n, tile_n)
    tg_tile = tile_n // pack

    # Clamp indices so out-of-range ids can never select rows from a neighboring
    # pack block; padding tokens use (id=0, rbp=M -> zero row of one_hot_pos).
    idx_flat = jnp.zeros((n_pad,), jnp.int32).at[:n].set(
        jnp.clip(idx.reshape(-1).astype(jnp.int32), 0, V - 1))
    rbp_flat = jnp.full((n_pad,), M, jnp.int32).at[:n].set(
        jnp.clip(root_bond_pos.reshape(-1).astype(jnp.int32), 0, M))
    ids = jnp.concatenate(
        [idx_flat.reshape(-1, pack), rbp_flat.reshape(-1, pack)], axis=1)  # (n_pad//pack, 2*pack)

    # VMEM budget: constant table (2 buffers allocated by the pipeline), pipelined
    # ids/out tiles, selector + matmul-result intermediates; capped at 75% of the
    # chip's physical VMEM (96 MiB on v5e/v6e, 48 MiB on v7x).
    table_bytes = table.size * 4
    io_bytes = 2 * tg_tile * (2 * pack + pack * D) * 4
    work_bytes = tg_tile * (pack * (V + Mp1) + 2 * pack * D) * 4
    needed = 2 * table_bytes + io_bytes + 2 * work_bytes + (4 << 20)
    vmem_limit = int(min(max(needed, 32 << 20), (_vmem_cap_bytes() * 3) // 4))

    kernel = functools.partial(_frag_embed_kernel, pack=pack, vocab=V, mp1=Mp1, d=D)
    out = pl.pallas_call(
        kernel,
        out_shape=jax.ShapeDtypeStruct((n_pad // pack, pack * D), jnp.float32),
        grid=(n_pad // tile_n,),
        in_specs=[
            pl.BlockSpec((tg_tile, 2 * pack), lambda i: (i, 0)),   # merged index tile
            pl.BlockSpec(table.shape, lambda i: (0, 0)),           # fused constant table
        ],
        out_specs=pl.BlockSpec((tg_tile, pack * D), lambda i: (i, 0)),
        compiler_params=pltpu.CompilerParams(
            dimension_semantics=("parallel",),
            vmem_limit_bytes=vmem_limit,
        ),
    )(ids, table)

    # Row-major (n_pad//pack, pack*D) is bit-identical to (n_pad, D): free reshape.
    return out.reshape(n_pad, D)[:n].reshape(B, S, D)


def make_params(key, embed_dim, vocab_size, max_bond_cnt):
    k_emb, k_bpt, k_w, k_b = jax.random.split(key, 4)
    # nn.Embedding default: N(0, 1)
    embedding = jax.random.normal(k_emb, (vocab_size, embed_dim), jnp.float32)
    # bond_pos_tensor: (vocab_size + 1, max_bond_cnt), synthetic 0/1 pattern
    bond_pos_tensors = jax.random.bernoulli(
        k_bpt, 0.5, (vocab_size + 1, max_bond_cnt)).astype(jnp.float32)
    # one_hot_pos: eye(M) with an extra zero row
    one_hot_pos = jnp.concatenate(
        [jnp.eye(max_bond_cnt, dtype=jnp.float32),
         jnp.zeros((1, max_bond_cnt), jnp.float32)], axis=0)
    # nn.Linear(max_bond_cnt, embed_dim) default init: U(-1/sqrt(in), 1/sqrt(in))
    bound = 1.0 / (max_bond_cnt ** 0.5)
    proj_weight = jax.random.uniform(k_w, (embed_dim, max_bond_cnt), jnp.float32,
                                     -bound, bound)
    proj_bias = jax.random.uniform(k_b, (embed_dim,), jnp.float32, -bound, bound)
    return {
        "embedding": embedding,
        "bond_pos_tensors": bond_pos_tensors,
        "one_hot_pos": one_hot_pos,
        "proj_weight_t": proj_weight.T,   # (M, D)
        "proj_bias": proj_bias,
    }


def reference_forward(idx, root_bond_pos, params):
    emb = params["embedding"][idx]                                        # (B,S,D)
    one_hot = params["bond_pos_tensors"][idx] + params["one_hot_pos"][root_bond_pos]
    w = jnp.dot(one_hot, params["proj_weight_t"],
                precision=jax.lax.Precision.HIGHEST) + params["proj_bias"]
    return emb * w


if __name__ == "__main__":
    embed_dim = 32
    vocab_size = 16
    max_bond_cnt = 8
    B, S = 2, 8

    key = jax.random.PRNGKey(0)
    k_params, k_idx, k_rbp = jax.random.split(key, 3)
    params = make_params(k_params, embed_dim, vocab_size, max_bond_cnt)

    # One-time table precompute, hoisted out of the per-call path.
    tables = prepare_frag_embed_tables(params)
    jax.block_until_ready(tables["table"])

    idx = jax.random.randint(k_idx, (B, S), 0, vocab_size, jnp.int32)
    # root_bond_pos in [0, max_bond_cnt]; value == max_bond_cnt selects the zero row
    root_bond_pos = jax.random.randint(k_rbp, (B, S), 0, max_bond_cnt + 1, jnp.int32)

    out = frag_embeddings_forward(idx, root_bond_pos, tables)
    out = jax.block_until_ready(out)

    ref = reference_forward(idx, root_bond_pos, params)
    assert out.shape == (B, S, embed_dim)
    assert jnp.allclose(out, ref, atol=1e-4, rtol=1e-4), "mismatch vs reference"

    print("KERNEL_OK")
</pallas_src>

<mosaic_0001>
module attributes {stable_mosaic.version = 11 : i64} {
  func.func @_frag_embed_kernel(%arg0: i32, %arg1: memref<8x8xi32, #tpu.memory_space<vmem>>, %arg2: memref<100x256xf32, #tpu.memory_space<vmem>>, %arg3: memref<8x128xf32, #tpu.memory_space<vmem>>) attributes {dimension_semantics = [#tpu.dimension_semantics<parallel>], iteration_bounds = array<i64: 1>, scalar_prefetch = 0 : i64, scratch_operands = 0 : i64, tpu.core_type = #tpu.core_type<tc>, window_params = [{transform_indices = @transform_0, window_bounds = array<i64: 8, 8>}, {pipeline_mode = #tpu.pipeline_mode<synchronous>, transform_indices = @transform_1, window_bounds = array<i64: 100, 256>}, {transform_indices = @transform_2, window_bounds = array<i64: 8, 128>}]} {
    %0 = tpu.iota {dimensions = array<i32: 1>} : vector<8x100xi32>
    %c0 = arith.constant 0 : index
    %c0_0 = arith.constant 0 : index
    %1 = vector.load %arg1[%c0, %c0_0] : memref<8x8xi32, #tpu.memory_space<vmem>>, vector<8x1xi32>
    %c0_1 = arith.constant 0 : index
    %c4 = arith.constant 4 : index
    %2 = vector.load %arg1[%c0_1, %c4] : memref<8x8xi32, #tpu.memory_space<vmem>>, vector<8x1xi32>
    %c0_i32 = arith.constant 0 : i32
    %3 = vector.broadcast %c0_i32 : i32 to vector<8x1xi32>
    %4 = arith.addi %1, %3 : vector<8x1xi32>
    %5 = vector.broadcast %4 : vector<8x1xi32> to vector<8x100xi32>
    %6 = arith.cmpi eq, %0, %5 : vector<8x100xi32>
    %c64_i32 = arith.constant 64 : i32
    %7 = vector.broadcast %c64_i32 : i32 to vector<8x1xi32>
    %8 = arith.addi %7, %2 : vector<8x1xi32>
    %c0_i32_2 = arith.constant 0 : i32
    %9 = vector.broadcast %c0_i32_2 : i32 to vector<8x1xi32>
    %10 = arith.addi %8, %9 : vector<8x1xi32>
    %11 = vector.broadcast %10 : vector<8x1xi32> to vector<8x100xi32>
    %12 = arith.cmpi eq, %0, %11 : vector<8x100xi32>
    %13 = arith.ori %6, %12 : vector<8x100xi1>
    %c0_3 = arith.constant 0 : index
    %c1 = arith.constant 1 : index
    %14 = vector.load %arg1[%c0_3, %c1] : memref<8x8xi32, #tpu.memory_space<vmem>>, vector<8x1xi32>
    %c0_4 = arith.constant 0 : index
    %c5 = arith.constant 5 : index
    %15 = vector.load %arg1[%c0_4, %c5] : memref<8x8xi32, #tpu.memory_space<vmem>>, vector<8x1xi32>
    %c16_i32 = arith.constant 16 : i32
    %16 = vector.broadcast %c16_i32 : i32 to vector<8x1xi32>
    %17 = arith.addi %14, %16 : vector<8x1xi32>
    %18 = vector.broadcast %17 : vector<8x1xi32> to vector<8x100xi32>
    %19 = arith.cmpi eq, %0, %18 : vector<8x100xi32>
    %c64_i32_5 = arith.constant 64 : i32
    %20 = vector.broadcast %c64_i32_5 : i32 to vector<8x1xi32>
    %21 = arith.addi %20, %15 : vector<8x1xi32>
    %c9_i32 = arith.constant 9 : i32
    %22 = vector.broadcast %c9_i32 : i32 to vector<8x1xi32>
    %23 = arith.addi %21, %22 : vector<8x1xi32>
    %24 = vector.broadcast %23 : vector<8x1xi32> to vector<8x100xi32>
    %25 = arith.cmpi eq, %0, %24 : vector<8x100xi32>
    %26 = arith.ori %19, %25 : vector<8x100xi1>
    %27 = arith.ori %13, %26 : vector<8x100xi1>
    %c0_6 = arith.constant 0 : index
    %c2 = arith.constant 2 : index
    %28 = vector.load %arg1[%c0_6, %c2] : memref<8x8xi32, #tpu.memory_space<vmem>>, vector<8x1xi32>
    %c0_7 = arith.constant 0 : index
    %c6 = arith.constant 6 : index
    %29 = vector.load %arg1[%c0_7, %c6] : memref<8x8xi32, #tpu.memory_space<vmem>>, vector<8x1xi32>
    %c32_i32 = arith.constant 32 : i32
    %30 = vector.broadcast %c32_i32 : i32 to vector<8x1xi32>
    %31 = arith.addi %28, %30 : vector<8x1xi32>
    %32 = vector.broadcast %31 : vector<8x1xi32> to vector<8x100xi32>
    %33 = arith.cmpi eq, %0, %32 : vector<8x100xi32>
    %c64_i32_8 = arith.constant 64 : i32
    %34 = vector.broadcast %c64_i32_8 : i32 to vector<8x1xi32>
    %35 = arith.addi %34, %29 : vector<8x1xi32>
    %c18_i32 = arith.constant 18 : i32
    %36 = vector.broadcast %c18_i32 : i32 to vector<8x1xi32>
    %37 = arith.addi %35, %36 : vector<8x1xi32>
    %38 = vector.broadcast %37 : vector<8x1xi32> to vector<8x100xi32>
    %39 = arith.cmpi eq, %0, %38 : vector<8x100xi32>
    %40 = arith.ori %33, %39 : vector<8x100xi1>
    %41 = arith.ori %27, %40 : vector<8x100xi1>
    %c0_9 = arith.constant 0 : index
    %c3 = arith.constant 3 : index
    %42 = vector.load %arg1[%c0_9, %c3] : memref<8x8xi32, #tpu.memory_space<vmem>>, vector<8x1xi32>
    %c0_10 = arith.constant 0 : index
    %c7 = arith.constant 7 : index
    %43 = vector.load %arg1[%c0_10, %c7] : memref<8x8xi32, #tpu.memory_space<vmem>>, vector<8x1xi32>
    %c48_i32 = arith.constant 48 : i32
    %44 = vector.broadcast %c48_i32 : i32 to vector<8x1xi32>
    %45 = arith.addi %42, %44 : vector<8x1xi32>
    %46 = vector.broadcast %45 : vector<8x1xi32> to vector<8x100xi32>
    %47 = arith.cmpi eq, %0, %46 : vector<8x100xi32>
    %c64_i32_11 = arith.constant 64 : i32
    %48 = vector.broadcast %c64_i32_11 : i32 to vector<8x1xi32>
    %49 = arith.addi %48, %43 : vector<8x1xi32>
    %c27_i32 = arith.constant 27 : i32
    %50 = vector.broadcast %c27_i32 : i32 to vector<8x1xi32>
    %51 = arith.addi %49, %50 : vector<8x1xi32>
    %52 = vector.broadcast %51 : vector<8x1xi32> to vector<8x100xi32>
    %53 = arith.cmpi eq, %0, %52 : vector<8x100xi32>
    %54 = arith.ori %47, %53 : vector<8x100xi1>
    %55 = arith.ori %41, %54 : vector<8x100xi1>
    %56 = arith.extui %55 : vector<8x100xi1> to vector<8x100xi32>
    %57 = arith.sitofp %56 : vector<8x100xi32> to vector<8x100xf32>
    %c0_12 = arith.constant 0 : index
    %c0_13 = arith.constant 0 : index
    %58 = vector.load %arg2[%c0_12, %c0_13] : memref<100x256xf32, #tpu.memory_space<vmem>>, vector<100x256xf32>
    %cst = arith.constant dense<0.000000e+00> : vector<8x256xf32>
    %59 = tpu.matmul %57, %58, %cst {dimension_numbers = #tpu.dot_dimension_numbers<[1], [0], [0], [1], [0, 0, 1, 1], [], []>, precision = #tpu.contract_precision<fp32>} : vector<8x100xf32>, vector<100x256xf32>, vector<8x256xf32> -> vector<8x256xf32>
    %60 = vector.extract_strided_slice %59 {offsets = [0, 0], sizes = [8, 128], strides = [1, 1]} : vector<8x256xf32> to vector<8x128xf32>
    %61 = vector.extract_strided_slice %59 {offsets = [0, 128], sizes = [8, 128], strides = [1, 1]} : vector<8x256xf32> to vector<8x128xf32>
    %62 = arith.mulf %60, %61 : vector<8x128xf32>
    %c0_14 = arith.constant 0 : index
    %c0_15 = arith.constant 0 : index
    %63 = vector.load %arg3[%c0_14, %c0_15] : memref<8x128xf32, #tpu.memory_space<vmem>>, vector<8x128xf32>
    tpu.vector_store %arg3[%c0_14, %c0_15], %62 {strides = array<i32>} : memref<8x128xf32, #tpu.memory_space<vmem>>, vector<8x128xf32>,
    return
  }
  func.func @transform_0(%arg0: i32) -> (i32, i32) {
    %c0_i32 = arith.constant 0 : i32
    %c0_i32_0 = arith.constant 0 : i32
    return %arg0, %c0_i32 : i32, i32
  }
  func.func @transform_1(%arg0: i32) -> (i32, i32) {
    %c0_i32 = arith.constant 0 : i32
    %c0_i32_0 = arith.constant 0 : i32
    %c0_i32_1 = arith.constant 0 : i32
    return %c0_i32, %c0_i32_0 : i32, i32
  }
  func.func @transform_2(%arg0: i32) -> (i32, i32) {
    %c0_i32 = arith.constant 0 : i32
    %c0_i32_0 = arith.constant 0 : i32
    return %arg0, %c0_i32 : i32, i32
  }
}

</mosaic_0001>

<bundles_post_ra>
// kernel: tpu_custom_call.1
= control target key start
LH: loop header
LB: loop body
LE: loop exit
PB: predicated region body
PF: predicated region fallthrough
CT: control target
= control target key end

     0   :  { %7 = vsyncpa [#allocation3], 0  ;;  %s1473_s0 = inlined_call_operand.hbm [shape: s32[8,8], index: 0, kind: input, shape index: {}]   ;;  %s1474_s1 = inlined_call_operand.hbm [shape: f32[100,256], index: 1, kind: input, shape index: {}]   ;;  %s1475_s2 = inlined_call_operand.hbm [shape: f32[8,128], index: 2, kind: output, shape index: {}]  }
   0x1   :  { %8 = vsyncpa [#allocation6], 0 }
   0x2   :  { %9 = vsyncpa [#allocation4], 0  ;;  %s1014_s9 = smov [#allocation2]   ;;  %s1015_s11 = smov [#allocation5]  }
   0x3   :  { %s16_s10 = sshll.u32 %s1014_s9, 4  ;;  %s25_s12 = sshll.u32 %s1015_s11, 4  ;;  %s17_s10 = int_to_ptr.vmem [resolvable:$true] %s16_s10  ;;  %s26_s12 = int_to_ptr.vmem [resolvable:$true] %s25_s12 }
   0x4   :  { %s956_s13 = scalar_lea.vmem %s17_s10, 128  ;;  %p961_p1 = scmp.lt.s32.totalorder %s17_s10, %s17_s10 }
   0x5   :  { %p957_p0 = scmp.ne.s32.totalorder %s17_s10, %s956_s13  ;;  %p962_p2 = scmp.lt.s32.totalorder %s956_s13, %s956_s13 }
   0x7   :  { %p963_p3 = por %p962_p2, %p961_p1 }
   0x9   :  { %p964_p4 = pnand %p963_p3, %p957_p0 }
   0xb   :  { %967 = shalt.err (!%p964_p4)
}
   0xc   :  { %19 = dma.hbm_to_vmem [thread:$0]  %s1473_s0, 128, %s17_s10, [#allocation3]  }
   0xd   :  { %s976_s16 = scalar_lea.vmem %s26_s12, 3328  ;;  %p981_p6 = scmp.lt.s32.totalorder %s26_s12, %s26_s12 }
   0xe   :  { %p977_p5 = scmp.ne.s32.totalorder %s26_s12, %s976_s16  ;;  %p982_p7 = scmp.lt.s32.totalorder %s976_s16, %s976_s16 }
  0x10   :  { %p983_p8 = por %p982_p7, %p981_p6 }
  0x12   :  { %p984_p9 = pnand %p983_p8, %p977_p5 }
  0x14   :  { %987 = shalt.err (!%p984_p9)
}
  0x15   :  { %s1016_s17 = smov 256   ;;  %s1017_s18 = smov 16  }
  0x16   :  { %31 = dma.hbm_to_vmem [thread:$0]  %s1474_s1, 3328, %s26_s12, [#allocation6], %s1016_s17, %s1016_s17, %s1017_s18  }
  0x17   :  { %1008 = dma.done.wait [#allocation3], 128  }
  0x18   :  { %1009 = vsyncadd [#allocation3], 4294967168 }
  0x19   :  { %1010 = dma.done.wait [#allocation6], 3328  }
  0x1a   :  { %1011 = vsyncadd [#allocation6], 4294963968  ;;  %v1018_v0 = vmov 0   ;;  %v1019_v1 = vmov 1   ;;  %vm119_vm0 = vcmask 1043456   ;;  %v40_v2 = vld [vmem:[#allocation2] sm:$0xff] }
  0x1b   :  { %939 = vset.pattern.permute.xlu0 %v1018_v0  ;;  %941 = vset.pattern.permute.xlu1 %v1019_v1  ;;  %v114_v3 = vld [vmem:[#allocation5 + $0xc8] sm:$0xf]  ;;  %v113_v4 = vld [vmem:[#allocation5 + $0xc0] sm:$0xf]  ;;  %v51_v5 = vadd.s32 16, %v40_v2  ;;  %v45_v6 = vadd.s32 64, %v40_v2 }
  0x1c   :  { %42 = vperm.xlu0 %939, %v40_v2   ;;  %v63_v7 = vadd.s32 32, %v40_v2  ;;  %v1049_v8 = vadd.s32 48, %v40_v2  ;;  %v112_v9 = vld [vmem:[#allocation5 + $0xb8] sm:$0xff]  ;;  %v111_v10 = vld [vmem:[#allocation5 + $0xb0] sm:$0xff]  ;;  %v124_v11 = vsel %vm119_vm0, %v114_v3, 0  ;;  %v121_v12 = vsel %vm119_vm0, %v113_v4, 0 }
  0x1d   :  { %v1051_v13 = vand.u32 4294901760, %v112_v9  ;;  %v1053_v14 = vand.u32 4294901760, %v111_v10  ;;  %v110_v15 = vld [vmem:[#allocation5 + $0xa8] sm:$0xff]  ;;  %v109_v16 = vld [vmem:[#allocation5 + $0xa0] sm:$0xff]  ;;  %53 = vperm.xlu1 %941, %v51_v5   ;;  %v68_v17 = vadd.s32 18, %v45_v6  ;;  %v1055_v18 = vadd.s32 9, %v45_v6 }
  0x1e   :  { %v1057_v19 = vadd.s32 27, %v45_v6  ;;  %v1059_v20 = vand.u32 4294901760, %v124_v11  ;;  %v108_v21 = vld [vmem:[#allocation5 + $0x98] sm:$0xff]  ;;  %v107_v22 = vld [vmem:[#allocation5 + $0x90] sm:$0xff]  ;;  %v1061_v23 = vand.u32 4294901760, %v121_v12  ;;  %v1069_v26 = vand.u32 4294901760, %v110_v15 }
  0x1f   :  { %v1064_v24 = vsub.f32 %v112_v9, %v1051_v13  ;;  %v1067_v25 = vsub.f32 %v111_v10, %v1053_v14  ;;  %v1020_v27 = vmov 4   ;;  %v1074_v29 = vand.u32 4294901760, %v109_v16  ;;  %v106_v49 = vld [vmem:[#allocation5 + $0x88] sm:$0xff]  ;;  %v105_v50 = vld [vmem:[#allocation5 + $0x80] sm:$0xff]  ;;  %v104_v56 = vld [vmem:[#allocation5 + $0x78] sm:$0xff]  ;;  %s1027_s0 = smov [#allocation7]  }
  0x20   :  { %940 = vset.pattern.permute.xlu0 %v1020_v27  ;;  %v1072_v28 = vsub.f32 %v124_v11, %v1059_v20  ;;  %v1076_v30 = vand.u32 4294901760, %v108_v21  ;;  %v1078_v31 = vand.u32 4294901760, %v107_v22  ;;  %133 = vmatprep.subr.mxu0 %v1059_v20  ;;  %v1082_v32 = vsub.f32 %v121_v12, %v1061_v23  ;;  %v103_v61 = vld [vmem:[#allocation5 + $0x70] sm:$0xff]  ;;  %v102_v62 = vld [vmem:[#allocation5 + $0x68] sm:$0xff]  ;;  %v101_v63 = vld [vmem:[#allocation5 + $0x60] sm:$0xff]  ;;  %s911_s1 = sshll.u32 %s1027_s0, 4  ;;  %s912_s1 = int_to_ptr.vmem [resolvable:$true] %s911_s1 }
  0x21   :  { %47 = vperm.xlu0 %940, %v45_v6   ;;  %v1491_v33 = vand.u32 4294901760, %v1064_v24  ;;  %v1489_v34 = vand.u32 4294901760, %v1067_v25  ;;  %v1087_v35 = vsub.f32 %v110_v15, %v1069_v26  ;;  %135 = vmatpush1.msra.mxu0 %v1061_v23  ;;  %v1021_v36 = vmov 2   ;;  %v100_v5 = vld [vmem:[#allocation5 + $0x58] sm:$0xff]  ;;  %v99_v6 = vld [vmem:[#allocation5 + $0x50] sm:$0xff]  ;;  %s988_s21 = scalar_lea.vmem %s912_s1, 128  ;;  %p993_p11 = scmp.lt.s32.totalorder %s912_s1, %s912_s1 }
  0x22   :  { %942 = vset.pattern.permute.xlu1 %v1021_v36  ;;  %v1494_v37 = vand.u32 4294901760, %v1072_v28  ;;  %v1092_v38 = vsub.f32 %v109_v16, %v1074_v29  ;;  %v1095_v39 = vsub.f32 %v108_v21, %v1076_v30  ;;  %v1098_v40 = vsub.f32 %v107_v22, %v1078_v31  ;;  %137 = vmatprep.subr.mxu0 %v1051_v13  ;;  %p989_p10 = scmp.ne.s32.totalorder %s912_s1, %s988_s21  ;;  %p994_p12 = scmp.lt.s32.totalorder %s988_s21, %s988_s21 }
  0x23   :  { %65 = vperm.xlu1 %942, %v63_v7   ;;  %v1493_v41 = vand.u32 4294901760, %v1082_v32  ;;  %v249_v42 = vsub.f32 %v1064_v24, %v1491_v33  ;;  %v255_v43 = vsub.f32 %v1067_v25, %v1489_v34  ;;  %v1488_v44 = vand.u32 4294901760, %v1087_v35  ;;  %139 = vmatpush1.msra.mxu0 %v1053_v14  ;;  %v89_v34 = vld [vmem:[#allocation5] sm:$0xff] }
  0x24   :  { %v237_v45 = vsub.f32 %v1072_v28, %v1494_v37  ;;  %v1486_v46 = vand.u32 4294901760, %v1092_v38  ;;  %v1485_v47 = vand.u32 4294901760, %v1095_v39  ;;  %v1484_v48 = vand.u32 4294901760, %v1098_v40  ;;  %141 = vmatprep.subr.mxu0 %v1069_v26  ;;  %p995_p13 = por %p994_p12, %p993_p11 }
  0x25   :  { %v1022_v51 = vmov 6   ;;  %v243_v52 = vsub.f32 %v1082_v32, %v1493_v41  ;;  %v250_v53 = vand.u32 4294901760, %v249_v42  ;;  %v256_v54 = vand.u32 4294901760, %v255_v43  ;;  %143 = vmatpush1.msra.mxu0 %v1074_v29 }
  0x26   :  { %944 = vset.pattern.permute.xlu0 %v1022_v51  ;;  %v261_v55 = vsub.f32 %v1087_v35, %v1488_v44  ;;  %v238_v57 = vand.u32 4294901760, %v237_v45  ;;  %v267_v58 = vsub.f32 %v1092_v38, %v1486_v46  ;;  %v273_v59 = vsub.f32 %v1095_v39, %v1485_v47  ;;  %145 = vmatprep.subr.mxu0 %v1076_v30  ;;  %v90_v44 = vld [vmem:[#allocation5 + $0x8] sm:$0xff]  ;;  %p996_p0 = pnand %p995_p13, %p989_p10 }
  0x27   :  { %70 = vperm.xlu0 %944, %v68_v17   ;;  %v279_v60 = vsub.f32 %v1098_v40, %v1484_v48  ;;  %v1023_v0 = vmov 5   ;;  %v244_v1 = vand.u32 4294901760, %v243_v52  ;;  %v1134_v3 = vand.u32 4294901760, %v106_v49  ;;  %147 = vmatpush1.msra.mxu0 %v1078_v31 }
  0x28   :  { %943 = vset.pattern.permute.xlu1 %v1023_v0  ;;  %v262_v2 = vand.u32 4294901760, %v261_v55  ;;  %v1136_v4 = vand.u32 4294901760, %v105_v50  ;;  %239 = vmatprep.subr.mxu1 %v238_v57  ;;  %v268_v7 = vand.u32 4294901760, %v267_v58  ;;  %v274_v9 = vand.u32 4294901760, %v273_v59 }
  0x29   :  { %58 = vperm.xlu1 %943, %v1055_v18   ;;  %v280_v10 = vand.u32 4294901760, %v279_v60  ;;  %v1140_v11 = vand.u32 4294901760, %v104_v56  ;;  %245 = vmatpush1.msra.mxu1 %v244_v1  ;;  %v1143_v12 = vsub.f32 %v106_v49, %v1134_v3  ;;  %v1148_v16 = vand.u32 4294901760, %v103_v61 }
  0x2a   :  { %v1146_v15 = vsub.f32 %v105_v50, %v1136_v4  ;;  %v1150_v17 = vand.u32 4294901760, %v102_v62  ;;  %149 = vmatprep.subr.mxu0 %v1134_v3  ;;  %251 = vmatprep.subr.mxu1 %v250_v53  ;;  %v1156_v21 = vand.u32 4294901760, %v101_v63  ;;  %v1158_v22 = vand.u32 4294901760, %v100_v5 }
  0x2b   :  { %v1154_v18 = vsub.f32 %v104_v56, %v1140_v11  ;;  %v1160_v27 = vand.u32 4294901760, %v99_v6  ;;  %151 = vmatpush1.msra.mxu0 %v1136_v4  ;;  %257 = vmatpush1.msra.mxu1 %v256_v54  ;;  %v1483_v36 = vand.u32 4294901760, %v1143_v12  ;;  %v1166_v43 = vsub.f32 %v103_v61, %v1148_v16  ;;  %v98_v61 = vld [vmem:[#allocation5 + $0x48] sm:$0xff] }
  0x2c   :  { %v1481_v42 = vand.u32 4294901760, %v1146_v15  ;;  %v1169_v45 = vsub.f32 %v102_v62, %v1150_v17  ;;  %153 = vmatprep.subr.mxu0 %v1140_v11  ;;  %v1024_v49 = vmov 3   ;;  %263 = vmatprep.subr.mxu1 %v262_v2  ;;  %v1174_v51 = vsub.f32 %v101_v63, %v1156_v21  ;;  %v97_v62 = vld [vmem:[#allocation5 + $0x40] sm:$0xff] }
  0x2d   :  { %945 = vset.pattern.permute.xlu1 %v1024_v49  ;;  %v1479_v50 = vand.u32 4294901760, %v1154_v18  ;;  %v1177_v52 = vsub.f32 %v100_v5, %v1158_v22  ;;  %v1180_v53 = vsub.f32 %v99_v6, %v1160_v27  ;;  %269 = vmatpush1.msra.mxu1 %v268_v7  ;;  %v285_v54 = vsub.f32 %v1143_v12, %v1483_v36  ;;  %v96_v5 = vld [vmem:[#allocation5 + $0x38] sm:$0xff]  ;;  %v95_v49 = vld [vmem:[#allocation5 + $0x30] sm:$0xff] }
  0x2e   :  { %77 = vperm.xlu1 %945, %v1049_v8   ;;  %v291_v55 = vsub.f32 %v1146_v15, %v1481_v42  ;;  %v1477_v56 = vand.u32 4294901760, %v1166_v43  ;;  %v1476_v57 = vand.u32 4294901760, %v1169_v45  ;;  %275 = vmatprep.subr.mxu1 %v274_v9  ;;  %v1478_v8 = vand.u32 4294901760, %v1174_v51  ;;  %v91_v42 = vld [vmem:[#allocation5 + $0x10] sm:$0xff] }
  0x2f   :  { %v297_v58 = vsub.f32 %v1154_v18, %v1479_v50  ;;  %v1480_v59 = vand.u32 4294901760, %v1177_v52  ;;  %v1482_v60 = vand.u32 4294901760, %v1180_v53  ;;  %155 = vmatpush1.msra.mxu0 %v1148_v16  ;;  %281 = vmatpush1.msra.mxu1 %v280_v10  ;;  %v286_v63 = vand.u32 4294901760, %v285_v54  ;;  %v94_v54 = vld [vmem:[#allocation5 + $0x28] sm:$0xff] }
  0x30   :  { %v292_v0 = vand.u32 4294901760, %v291_v55  ;;  %v303_v1 = vsub.f32 %v1166_v43, %v1477_v56  ;;  %v309_v2 = vsub.f32 %v1169_v45, %v1476_v57  ;;  %157 = vmatprep.subr.mxu0 %v1150_v17  ;;  %v315_v7 = vsub.f32 %v1174_v51, %v1478_v8  ;;  %v93_v55 = vld [vmem:[#allocation5 + $0x20] sm:$0xff] }
  0x31   :  { %v298_v6 = vand.u32 4294901760, %v297_v58  ;;  %v321_v9 = vsub.f32 %v1177_v52, %v1480_v59  ;;  %v327_v10 = vsub.f32 %v1180_v53, %v1482_v60  ;;  %159 = vmatpush1.msra.mxu0 %v1156_v21  ;;  %v1025_v57 = vmov 7   ;;  %287 = vmatprep.subr.mxu1 %v286_v63  ;;  %v92_v59 = vld [vmem:[#allocation5 + $0x18] sm:$0xff] }
  0x32   :  { %947 = vset.pattern.permute.xlu0 %v1025_v57  ;;  %946 = vset.pattern.permute.xlu1 %v1025_v57  ;;  %v304_v58 = vand.u32 4294901760, %v303_v1  ;;  %v310_v56 = vand.u32 4294901760, %v309_v2  ;;  %v1215_v8 = vand.u32 4294901760, %v98_v61  ;;  %v1217_v50 = vand.u32 4294901760, %v97_v62 }
  0x33   :  { %82 = vperm.xlu1 %946, %v1057_v19   ;;  %293 = vmatpush1.msra.mxu1 %v292_v0  ;;  %v316_v60 = vand.u32 4294901760, %v315_v7  ;;  %v322_v36 = vand.u32 4294901760, %v321_v9  ;;  %v328_v48 = vand.u32 4294901760, %v327_v10  ;;  %v1220_v47 = vand.u32 4294901760, %v96_v5 }
  0x34   :  { %299 = vmatprep.subr.mxu1 %v298_v6  ;;  %v1223_v57 = vsub.f32 %v98_v61, %v1215_v8  ;;  %v1226_v63 = vsub.f32 %v97_v62, %v1217_v50  ;;  %v1228_v1 = vand.u32 4294901760, %v95_v49  ;;  %v1230_v2 = vand.u32 4294901760, %v94_v54  ;;  %161 = vmatprep.subr.mxu0 %v1158_v22 }
  0x35   :  { %305 = vmatpush1.msra.mxu1 %v304_v58  ;;  %v1234_v19 = vsub.f32 %v96_v5, %v1220_v47  ;;  %v1236_v0 = vand.u32 4294901760, %v93_v55  ;;  %v1238_v7 = vand.u32 4294901760, %v92_v59  ;;  %v1240_v6 = vand.u32 4294901760, %v91_v42  ;;  %163 = vmatpush1.msra.mxu0 %v1160_v27 }
  0x36   :  { %311 = vmatprep.subr.mxu1 %v310_v56  ;;  %v1487_v61 = vand.u32 4294901760, %v1223_v57  ;;  %v1490_v62 = vand.u32 4294901760, %v1226_v63  ;;  %v1246_v9 = vsub.f32 %v95_v49, %v1228_v1  ;;  %v1249_v10 = vsub.f32 %v94_v54, %v1230_v2  ;;  %165 = vmatprep.subr.mxu0 %v1215_v8 }
  0x37   :  { %317 = vmatpush1.msra.mxu1 %v316_v60  ;;  %v1492_v5 = vand.u32 4294901760, %v1234_v19  ;;  %v1254_v58 = vsub.f32 %v93_v55, %v1236_v0  ;;  %v1257_v56 = vsub.f32 %v92_v59, %v1238_v7  ;;  %v1260_v46 = vsub.f32 %v91_v42, %v1240_v6  ;;  %167 = vmatpush1.msra.mxu0 %v1217_v50 }
  0x38   :  { %1506 = vst [vmem:[#allocation11_spill] sm:$0xff] %v1249_v10  ;;  %323 = vmatprep.subr.mxu1 %v322_v36  ;;  %v333_v49 = vsub.f32 %v1223_v57, %v1487_v61  ;;  %v339_v60 = vsub.f32 %v1226_v63, %v1490_v62  ;;  %v1495_v54 = vand.u32 4294901760, %v1246_v9  ;;  %v1496_v55 = vand.u32 4294901760, %v1249_v10  ;;  %169 = vmatprep.subr.mxu0 %v1220_v47 }
  0x39   :  { %1507 = vst [vmem:[#allocation12_spill] sm:$0xff] %v1257_v56  ;;  %329 = vmatpush1.msra.mxu1 %v328_v48  ;;  %v345_v42 = vsub.f32 %v1234_v19, %v1492_v5  ;;  %v1499_v36 = vand.u32 4294901760, %v1254_v58  ;;  %v1500_v59 = vand.u32 4294901760, %v1257_v56  ;;  %v1503_v61 = vand.u32 4294901760, %v1260_v46  ;;  %171 = vmatpush1.msra.mxu0 %v1228_v1 }
  0x3a   :  { %v334_v62 = vand.u32 4294901760, %v333_v49  ;;  %v340_v33 = vand.u32 4294901760, %v339_v60  ;;  %v351_v48 = vsub.f32 %v1246_v9, %v1495_v54  ;;  %v357_v5 = vsub.f32 %v1249_v10, %v1496_v55  ;;  %173 = vmatprep.subr.mxu0 %v1230_v2 }
  0x3b   :  { %v346_v41 = vand.u32 4294901760, %v345_v42  ;;  %v363_v37 = vsub.f32 %v1254_v58, %v1499_v36  ;;  %v369_v49 = vsub.f32 %v1257_v56, %v1500_v59  ;;  %v375_v60 = vsub.f32 %v1260_v46, %v1503_v61  ;;  %175 = vmatpush1.msra.mxu0 %v1236_v0 }
  0x3c   :  { %335 = vmatprep.subr.mxu1 %v334_v62  ;;  %v352_v54 = vand.u32 4294901760, %v351_v48  ;;  %v358_v55 = vand.u32 4294901760, %v357_v5  ;;  %v1296_v10 = vand.u32 4294901760, %v90_v44  ;;  %v1298_v42 = vand.u32 4294901760, %v89_v34  ;;  %177 = vmatprep.subr.mxu0 %v1238_v7 }
  0x3d   :  { %341 = vmatpush1.msra.mxu1 %v340_v33  ;;  %v364_v36 = vand.u32 4294901760, %v363_v37  ;;  %179 = vmatpush1.msra.mxu0 %v1240_v6  ;;  %v370_v59 = vand.u32 4294901760, %v369_v49  ;;  %v1026_v62 = vmov 0.0   ;;  %v376_v5 = vand.u32 4294901760, %v375_v60 }
  0x3e   :  { %347 = vmatprep.subr.mxu1 %v346_v41  ;;  %v1303_v56 = vsub.f32 %v90_v44, %v1296_v10  ;;  %v1306_v61 = vsub.f32 %v89_v34, %v1298_v42  ;;  %422 = vmatprep.mubr.f32.mxu1 %v1026_v62  ;;  %vm115_vm15 = vcmask 818176  }
  0x3f   :  { %353 = vmatpush1.msra.mxu1 %v352_v54  ;;  %181 = vmatprep.subr.mxu0 %v1296_v10 }
  0x40   :  { %359 = vmatprep.subr.mxu1 %v358_v55  ;;  %v1504_v33 = vand.u32 4294901760, %v1303_v56  ;;  %v1505_v37 = vand.u32 4294901760, %v1306_v61  ;;  %183 = vmatpush1.msra.mxu0 %v1298_v42 }
  0x41   :  { %365 = vmatpush1.msra.mxu1 %v364_v36  ;;  %216 = vmatprep.mubr.f32.mxu0 %v1026_v62 }
  0x42   :  { %371 = vmatprep.subr.mxu1 %v370_v59  ;;  %v381_v34 = vsub.f32 %v1303_v56, %v1504_v33  ;;  %v387_v41 = vsub.f32 %v1306_v61, %v1505_v37  ;;  %438 = vmatprep.subr.mxu0 %v1072_v28  ;;  %v38_v59 = vlaneseq }
  0x43   :  { %377 = vmatpush1.msra.mxu1 %v376_v5 }
  0x44   :  { %v382_v44 = vand.u32 4294901760, %v381_v34  ;;  %v388_v54 = vand.u32 4294901760, %v387_v41  ;;  %v39_v60 = vand.u32 127, %v38_v59  ;;  %v1509_v59 = vld [vmem:[#allocation12_spill] sm:$0xff] }
  0x46   :  { %383 = vmatprep.subr.mxu1 %v382_v44 }
  0x47   :  { %389 = vmatpush1.msra.mxu1 %v388_v54 }
  0x48   :  { %562 = vmatprep.subr.mxu1 %v1059_v20 }
  0x97   :  { %v43_v36 = vpop.permute.xlu0 %42 }
  0x98   :  { %v54_v55 = vpop.permute.xlu1 %53  ;;  %vm44_vm1 = vcmp.eq.s32.totalorder %v39_v60, %v43_v36  ;;  %v1508_v36 = vld [vmem:[#allocation11_spill] sm:$0xff] }
  0x99   :  { %vm55_vm4 = vcmp.eq.s32.totalorder %v39_v60, %v54_v55 }
  0x9c   :  { %v48_v49 = vpop.permute.xlu0 %47 }
  0x9d   :  { %vm49_vm2 = vcmp.eq.s32.totalorder %v39_v60, %v48_v49 }
  0x9e   :  { %v66_v48 = vpop.permute.xlu1 %65  ;;  %vm50_vm5 = vmor %vm44_vm1, %vm49_vm2 }
  0x9f   :  { %vm67_vm9 = vcmp.eq.s32.totalorder %v39_v60, %v66_v48 }
  0xa2   :  { %v71_v37 = vpop.permute.xlu0 %70 }
  0xa3   :  { %vm72_vm7 = vcmp.eq.s32.totalorder %v39_v60, %v71_v37 }
  0xa4   :  { %v59_v33 = vpop.permute.xlu1 %58  ;;  %vm73_vm10 = vmor %vm67_vm9, %vm72_vm7 }
  0xa5   :  { %vm60_vm3 = vcmp.eq.s32.totalorder %v39_v60, %v59_v33 }
  0xa6   :  { %vm61_vm6 = vmor %vm55_vm4, %vm60_vm3 }
  0xa7   :  { %vm62_vm8 = vmor %vm50_vm5, %vm61_vm6 }
  0xa8   :  { %vm74_vm12 = vmor %vm62_vm8, %vm73_vm10 }
  0xa9   :  { %v78_v5 = vpop.permute.xlu1 %77 }
  0xaa   :  { %vm79_vm11 = vcmp.eq.s32.totalorder %v39_v60, %v78_v5 }
  0xae   :  { %v83_v34 = vpop.permute.xlu1 %82 }
  0xaf   :  { %vm84_vm13 = vcmp.eq.s32.totalorder %v39_v60, %v83_v34 }
  0xb0   :  { %vm85_vm14 = vmor %vm79_vm11, %vm84_vm13 }
  0xb1   :  { %vm86_vm0 = vmor %vm74_vm12, %vm85_vm14 }
  0xb2   :  { %v1323_v41 = vsel %vm86_vm0, 1.0, %v1026_v62 }
  0xb3   :  { %v117_v33 = vsel %vm115_vm15, %v1323_v41, 0  ;;  %922 = vmatmul.mubr.msk.f32.vlgmr.msra.gmra.mxu1 %vm115_vm15, %v1323_v41 }
  0xb4   :  { %v1329_v37 = vsub.f32 %v117_v33, %v117_v33  ;;  %564 = vmatpush1.msra.mxu1 %v1061_v23  ;;  %645 = vmatprep.mubr.f32.mxu1 %v1026_v62 }
  0xb5   :  { %566 = vmatprep.subr.mxu1 %v1051_v13 }
  0xb6   :  { %568 = vmatpush1.msra.mxu1 %v1053_v14  ;;  %v219_v44 = vand.u32 4294901760, %v1329_v37 }
  0xb7   :  { %570 = vmatprep.subr.mxu1 %v1069_v26 }
  0xb8   :  { %572 = vmatpush1.msra.mxu1 %v1074_v29  ;;  %v220_v54 = vsub.f32 %v1329_v37, %v219_v44 }
  0xb9   :  { %574 = vmatprep.subr.mxu1 %v1076_v30 }
  0xba   :  { %576 = vmatpush1.msra.mxu1 %v1078_v31  ;;  %v221_v55 = vand.u32 4294901760, %v220_v54 }
  0xbb   :  { %578 = vmatprep.subr.mxu1 %v1134_v3 }
  0xbc   :  { %580 = vmatpush1.msra.mxu1 %v1136_v4  ;;  %222 = vmatmul.mubr.f32.vlgmr.msra.gmra.mxu0 %v221_v55 }
  0xbd   :  { %441 = vmatpush1.msra.mxu0 %v1082_v32  ;;  %582 = vmatprep.subr.mxu1 %v1140_v11 }
  0xbe   :  { %444 = vmatprep.subr.mxu0 %v1064_v24  ;;  %584 = vmatpush1.msra.mxu1 %v1148_v16 }
  0xbf   :  { %447 = vmatpush1.msra.mxu0 %v1067_v25  ;;  %586 = vmatprep.subr.mxu1 %v1150_v17 }
  0xc0   :  { %450 = vmatprep.subr.mxu0 %v1087_v35  ;;  %588 = vmatpush1.msra.mxu1 %v1156_v21 }
  0xc1   :  { %453 = vmatpush1.msra.mxu0 %v1092_v38  ;;  %590 = vmatprep.subr.mxu1 %v1158_v22 }
  0xc2   :  { %456 = vmatprep.subr.mxu0 %v1095_v39  ;;  %592 = vmatpush1.msra.mxu1 %v1160_v27 }
  0xc3   :  { %459 = vmatpush1.msra.mxu0 %v1098_v40  ;;  %594 = vmatprep.subr.mxu1 %v1215_v8 }
  0xc4   :  { %462 = vmatprep.subr.mxu0 %v1143_v12  ;;  %596 = vmatpush1.msra.mxu1 %v1217_v50 }
  0xc5   :  { %465 = vmatpush1.msra.mxu0 %v1146_v15  ;;  %598 = vmatprep.subr.mxu1 %v1220_v47 }
  0xc6   :  { %468 = vmatprep.subr.mxu0 %v1154_v18  ;;  %600 = vmatpush1.msra.mxu1 %v1228_v1 }
  0xc7   :  { %471 = vmatpush1.msra.mxu0 %v1166_v43  ;;  %602 = vmatprep.subr.mxu1 %v1230_v2 }
  0xc8   :  { %474 = vmatprep.subr.mxu0 %v1169_v45  ;;  %604 = vmatpush1.msra.mxu1 %v1236_v0 }
  0xc9   :  { %477 = vmatpush1.msra.mxu0 %v1174_v51  ;;  %606 = vmatprep.subr.mxu1 %v1238_v7 }
  0xca   :  { %480 = vmatprep.subr.mxu0 %v1177_v52  ;;  %608 = vmatpush1.msra.mxu1 %v1240_v6 }
  0xcb   :  { %483 = vmatpush1.msra.mxu0 %v1180_v53  ;;  %610 = vmatprep.subr.mxu1 %v1296_v10 }
  0xcc   :  { %486 = vmatprep.subr.mxu0 %v1223_v57  ;;  %612 = vmatpush1.msra.mxu1 %v1298_v42 }
  0xcd   :  { %489 = vmatpush1.msra.mxu0 %v1226_v63  ;;  %649 = vmatmul.mubr.f32.vlgmr.msra.gmra.mxu1 %v219_v44 }
  0xce   :  { %812 = vmatprep.subr.mxu1 %v1059_v20  ;;  %492 = vmatprep.subr.mxu0 %v1234_v19  ;;  %v1512_v20 = vand.u32 4294901760, %v1064_v24  ;;  %v1516_v24 = vand.u32 4294901760, %v1095_v39  ;;  %v1524_v39 = vand.u32 4294901760, %v1177_v52 }
  0xcf   :  { %814 = vmatpush1.msra.mxu1 %v1061_v23  ;;  %495 = vmatpush1.msra.mxu0 %v1246_v9  ;;  %v1513_v23 = vand.u32 4294901760, %v1067_v25  ;;  %v1517_v25 = vand.u32 4294901760, %v1098_v40  ;;  %v1525_v40 = vand.u32 4294901760, %v1180_v53 }
  0xd0   :  { %816 = vmatprep.subr.mxu1 %v1051_v13  ;;  %498 = vmatprep.subr.mxu0 %v1508_v36  ;;  %v1510_v13 = vand.u32 4294901760, %v1072_v28  ;;  %v1515_v28 = vand.u32 4294901760, %v1092_v38  ;;  %v1523_v38 = vand.u32 4294901760, %v1174_v51 }
  0xd1   :  { %818 = vmatpush1.msra.mxu1 %v1053_v14  ;;  %501 = vmatpush1.msra.mxu0 %v1254_v58  ;;  %v1511_v14 = vand.u32 4294901760, %v1082_v32  ;;  %v1521_v32 = vand.u32 4294901760, %v1166_v43 }
  0xd2   :  { %820 = vmatprep.subr.mxu1 %v1069_v26  ;;  %504 = vmatprep.subr.mxu0 %v1509_v59  ;;  %v1514_v26 = vand.u32 4294901760, %v1087_v35  ;;  %v1522_v35 = vand.u32 4294901760, %v1169_v45 }
  0xd3   :  { %822 = vmatpush1.msra.mxu1 %v1074_v29  ;;  %507 = vmatpush1.msra.mxu0 %v1260_v46  ;;  %v1518_v29 = vand.u32 4294901760, %v1143_v12  ;;  %v1530_v12 = vand.u32 4294901760, %v1508_v36 }
  0xd4   :  { %824 = vmatprep.subr.mxu1 %v1076_v30  ;;  %510 = vmatprep.subr.mxu0 %v1303_v56  ;;  %v1519_v30 = vand.u32 4294901760, %v1146_v15  ;;  %v1531_v15 = vand.u32 4294901760, %v1254_v58 }
  0xd5   :  { %826 = vmatpush1.msra.mxu1 %v1078_v31  ;;  %513 = vmatpush1.msra.mxu0 %v1306_v61  ;;  %v1520_v31 = vand.u32 4294901760, %v1154_v18  ;;  %v1534_v18 = vand.u32 4294901760, %v1303_v56 }
  0xd6   :  { %546 = vmatprep.mubr.f32.mxu0 %v1026_v62  ;;  %828 = vmatprep.subr.mxu1 %v1134_v3  ;;  %v1527_v3 = vand.u32 4294901760, %v1226_v63 }
  0xd7   :  { %549 = vmatmul.mubr.f32.vlgmr.msra.gmra.mxu0 %v1329_v37  ;;  %664 = vmatprep.subr.mxu0 %v1510_v13 }
  0xd8   :  { %830 = vmatpush1.msra.mxu1 %v1136_v4  ;;  %668 = vmatpush1.msra.mxu0 %v1511_v14  ;;  %v1528_v4 = vand.u32 4294901760, %v1234_v19 }
  0xd9   :  { %832 = vmatprep.subr.mxu1 %v1140_v11  ;;  %672 = vmatprep.subr.mxu0 %v1512_v20  ;;  %v1529_v11 = vand.u32 4294901760, %v1246_v9 }
  0xda   :  { %834 = vmatpush1.msra.mxu1 %v1148_v16  ;;  %676 = vmatpush1.msra.mxu0 %v1513_v23  ;;  %v1532_v16 = vand.u32 4294901760, %v1509_v59 }
  0xdb   :  { %836 = vmatprep.subr.mxu1 %v1150_v17  ;;  %680 = vmatprep.subr.mxu0 %v1514_v26  ;;  %v1533_v17 = vand.u32 4294901760, %v1260_v46 }
  0xdc   :  { %838 = vmatpush1.msra.mxu1 %v1156_v21  ;;  %684 = vmatpush1.msra.mxu0 %v1515_v28  ;;  %v1535_v21 = vand.u32 4294901760, %v1306_v61 }
  0xdd   :  { %840 = vmatprep.subr.mxu1 %v1158_v22  ;;  %688 = vmatprep.subr.mxu0 %v1516_v24 }
  0xde   :  { %842 = vmatpush1.msra.mxu1 %v1160_v27  ;;  %692 = vmatpush1.msra.mxu0 %v1517_v25 }
  0xdf   :  { %844 = vmatprep.subr.mxu1 %v1215_v8  ;;  %696 = vmatprep.subr.mxu0 %v1518_v29 }
  0xe0   :  { %846 = vmatpush1.msra.mxu1 %v1217_v50  ;;  %700 = vmatpush1.msra.mxu0 %v1519_v30 }
  0xe1   :  { %848 = vmatprep.subr.mxu1 %v1220_v47  ;;  %704 = vmatprep.subr.mxu0 %v1520_v31  ;;  %v1526_v47 = vand.u32 4294901760, %v1223_v57 }
  0xe2   :  { %850 = vmatpush1.msra.mxu1 %v1228_v1  ;;  %708 = vmatpush1.msra.mxu0 %v1521_v32 }
  0xe3   :  { %852 = vmatprep.subr.mxu1 %v1230_v2  ;;  %712 = vmatprep.subr.mxu0 %v1522_v35 }
  0xe4   :  { %854 = vmatpush1.msra.mxu1 %v1236_v0  ;;  %716 = vmatpush1.msra.mxu0 %v1523_v38 }
  0xe5   :  { %856 = vmatprep.subr.mxu1 %v1238_v7  ;;  %720 = vmatprep.subr.mxu0 %v1524_v39 }
  0xe6   :  { %858 = vmatpush1.msra.mxu1 %v1240_v6  ;;  %724 = vmatpush1.msra.mxu0 %v1525_v40 }
  0xe7   :  { %860 = vmatprep.subr.mxu1 %v1296_v10  ;;  %728 = vmatprep.subr.mxu0 %v1526_v47 }
  0xe8   :  { %862 = vmatpush1.msra.mxu1 %v1298_v42  ;;  %895 = vmatprep.mubr.f32.mxu1 %v1026_v62 }
  0xe9   :  { %732 = vmatpush1.msra.mxu0 %v1527_v3  ;;  %924 = vmatmul.mubr.msk.f32.vlgmr.msra.gmra.mxu1 %vm115_vm15, %v1323_v41 }
  0xea   :  { %736 = vmatprep.subr.mxu0 %v1528_v4  ;;  %797 = vmatprep.mubr.f32.mxu0 %v1026_v62 }
  0xeb   :  { %740 = vmatpush1.msra.mxu0 %v1529_v11 }
  0xec   :  { %744 = vmatprep.subr.mxu0 %v1530_v12 }
  0xed   :  { %748 = vmatpush1.msra.mxu0 %v1531_v15 }
  0xee   :  { %752 = vmatprep.subr.mxu0 %v1532_v16 }
  0xef   :  { %756 = vmatpush1.msra.mxu0 %v1533_v17 }
  0xf0   :  { %760 = vmatprep.subr.mxu0 %v1534_v18 }
  0xf1   :  { %764 = vmatpush1.msra.mxu0 %v1535_v21 }
  0xf2   :  { %923 = vmatmul.mubr.msk.f32.vlgmr.msra.gmra.mxu0 %vm115_vm15, %v1323_v41 }
 0x173   :  { %v425_v27 = vpop.f32.mrf.mxu1 }
 0x175   :  { %v427_v50 = vpop.f32.mrf.mxu1 }
 0x17c   :  { %v223_v22 = vpop.f32.mrf.mxu0 }
 0x17d   :  { %v426_v51 = vadd.f32 %v425_v27, %v223_v22 }
 0x17e   :  { %v225_v43 = vpop.f32.mrf.mxu0 }
 0x17f   :  { %v428_v8 = vadd.f32 %v427_v50, %v225_v43 }
 0x18d   :  { %v650_v52 = vpop.f32.mrf.mxu1 }
 0x18f   :  { %v652_v63 = vpop.f32.mrf.mxu1 }
 0x197   :  { %v550_v45 = vpop.f32.mrf.mxu0 }
 0x198   :  { %v551_v46 = vadd.f32 %v550_v45, %v426_v51 }
 0x199   :  { %v552_v53 = vpop.f32.mrf.mxu0 }
 0x19a   :  { %v553_v57 = vadd.f32 %v552_v53, %v428_v8  ;;  %v651_v1 = vadd.f32 %v650_v52, %v551_v46 }
 0x19c   :  { %v653_v7 = vadd.f32 %v652_v63, %v553_v57 }
 0x1a9   :  { %v898_v2 = vpop.f32.mrf.mxu1 }
 0x1ab   :  { %v900_v9 = vpop.f32.mrf.mxu1 }
 0x1b2   :  { %v800_v19 = vpop.f32.mrf.mxu0 }
 0x1b3   :  { %v801_v0 = vadd.f32 %v800_v19, %v651_v1 }
 0x1b4   :  { %v802_v6 = vpop.f32.mrf.mxu0 }
 0x1b5   :  { %v803_v61 = vadd.f32 %v802_v6, %v653_v7  ;;  %v899_v10 = vadd.f32 %v898_v2, %v801_v0 }
 0x1b7   :  { %v901_v58 = vadd.f32 %v900_v9, %v803_v61 }
 0x1b9   :  { %v903_v56 = vmul.f32 %v901_v58, %v899_v10 }
 0x1bb   :  { %904 = vst [vmem:[#allocation7] sm:$0xff] %v903_v56 }
 0x1bc   :  { %999 = shalt.err (!%p996_p0)
}
 0x1bd   :  { %914 = dma.vmem_to_hbm [thread:$0]  %s912_s1, 128, %s1475_s2, [#allocation4]  }
 0x1be   :  { %1012 = dma.done.wait [#allocation4], 128  }
 0x1bf   :  { %1013 = vsyncadd [#allocation4], 4294967168 }
 0x1c0   :  { %918 = vsyncpa [#allocation3], 1 }
 0x1c1   :  { %919 = vsyncpa [#allocation6], 1 }
 0x1c2   :  { %920 = vsyncpa [#allocation4], 1 }

</bundles_post_ra>
